<compile_context>
chip_gen: v7x
topology: tpu7x:2x2x1
jax: 0.10.0
libtpu: 0.0.40
codegen_flags: <defaults>
</compile_context>

<pallas_src>
import functools

import jax
import jax.numpy as jnp
from jax.experimental import pallas as pl
from jax.experimental.pallas import tpu as pltpu


def _round_up(a, b):
    return (a + b - 1) // b * b


# ----------------------------- fast path -----------------------------------


def _psi3_fast_kernel(x_ref, o_ref, *, nH, nW, k):
    """x_ref: (1, Cc, H, W) -> o_ref: (1, nH, nW, Cc*k*k) lane-dense slab."""
    x = x_ref[0]                                 # (Cc, H, W); H = nH*k, W = nW*k
    Cc = x.shape[0]
    x = x.reshape(Cc, nH, k, nW, k)              # split H -> (nH, k), W -> (nW, k)
    y = jnp.transpose(x, (1, 3, 0, 2, 4))        # (nH, nW, Cc, k, k)
    o_ref[0] = y.reshape(nH, nW, Cc * k * k)     # single lane-dense store


def _pick_c_chunks(C, H, W, nH, nW, k, itemsize, budget_bytes):
    """Smallest channel split whose padded, double-buffered tiles fit budget."""
    for d in range(1, C + 1):
        if C % d:
            continue
        cc = C // d
        if d > 1 and (cc * k * k) % 128 != 0:
            continue  # chunked output blocks must stay lane-aligned (128)
        in_b = cc * _round_up(H, 8) * _round_up(W, 128) * itemsize
        out_b = nH * _round_up(nW, 8) * _round_up(cc * k * k, 128) * itemsize
        if 3 * (in_b + out_b) <= budget_bytes:   # 2x double-buffer + relayout slack
            return d
    # TODO(synk): no lane-aligned channel split fits the budget; run unchunked.
    return 1


@functools.partial(jax.jit, static_argnums=(1, 2, 3))
def _psi3_fast(x, nH, nW, k):
    B, C, H, W = x.shape
    itemsize = jnp.dtype(x.dtype).itemsize
    # Conservative per-step budget so the same tiling also fits v7x (64 MiB VMEM).
    c_chunks = _pick_c_chunks(C, H, W, nH, nW, k, itemsize,
                              budget_bytes=32 * 1024 * 1024)
    Cc = C // c_chunks

    kernel = functools.partial(_psi3_fast_kernel, nH=nH, nW=nW, k=k)
    bytes_accessed = 2 * B * C * H * W * itemsize  # read once + write once

    out = pl.pallas_call(
        kernel,
        out_shape=jax.ShapeDtypeStruct((B, nH, nW, C * k * k), x.dtype),
        grid=(B, c_chunks),
        in_specs=[pl.BlockSpec((1, Cc, H, W), lambda b, ci: (b, ci, 0, 0))],
        out_specs=pl.BlockSpec((1, nH, nW, Cc * k * k), lambda b, ci: (b, 0, 0, ci)),
        compiler_params=pltpu.CompilerParams(
            dimension_semantics=("parallel", "parallel"),
            vmem_limit_bytes=48 * 1024 * 1024,
        ),
        cost_estimate=pl.CostEstimate(
            flops=0, transcendentals=0, bytes_accessed=bytes_accessed),
    )(x)
    # Free row-major regrouping to the PyTorch output shape.
    return out.reshape(B, nH * nW * C, k, k)


# --------------------------- fallback path ----------------------------------


def _psi3_safe_kernel(x_ref, o_ref, *, C, k, nW):
    """Per-block-column slice copies (no in-kernel transpose)."""
    x = x_ref[0]                                  # (C, k, W)
    for bc in range(nW):                          # static unroll over block cols
        o_ref[0, pl.ds(bc * C, C), :, :] = x[:, :, bc * k:(bc + 1) * k]


@functools.partial(jax.jit, static_argnums=(1, 2, 3))
def _psi3_safe(x, nH, nW, k):
    B, C, H, W = x.shape
    kernel = functools.partial(_psi3_safe_kernel, C=C, k=k, nW=nW)
    return pl.pallas_call(
        kernel,
        out_shape=jax.ShapeDtypeStruct((B, nH * nW * C, k, k), x.dtype),
        grid=(B, nH),
        in_specs=[pl.BlockSpec((1, C, k, W), lambda b, br: (b, 0, br, 0))],
        out_specs=pl.BlockSpec((1, nW * C, k, k), lambda b, br: (b, br, 0, 0)),
        compiler_params=pltpu.CompilerParams(
            dimension_semantics=("parallel", "parallel")),
    )(x)


# ------------------------------ wrapper --------------------------------------


def psi3_forward(x, block_size, padding=0):
    if padding != 0:
        # TODO(synk): padded/overlapping nn.Unfold (padding > 0) not implemented.
        raise NotImplementedError("padding != 0 not supported")
    B, C, H, W = x.shape
    bs = block_size
    if H % bs != 0 or W % bs != 0:
        raise ValueError("height and width must be divisible by block_size")
    k = H // bs  # unfold kernel_size == stride
    if W % k != 0:
        raise ValueError("width must be divisible by H // block_size")
    nH, nW = H // k, W // k

    # TODO(synk): sub-32-bit dtypes (bf16/int8) are untested; sublane packing may
    # need explicit handling (e.g. pltpu.bitcast 2xbf16 -> u32).
    try:
        return _psi3_fast(x, nH, nW, k)
    except Exception:
        # Safety net for Mosaic builds lacking the general in-kernel
        # reshape/transpose relayout; correct but slower (masked k-wide stores).
        return _psi3_safe(x, nH, nW, k)


def psi3_reference(x, block_size):
    # Pure-JAX reference of the PyTorch forward (reshape/transpose form).
    B, C, H, W = x.shape
    k = H // block_size
    nH, nW = H // k, W // k
    y = x.reshape(B, C, nH, k, nW, k)
    y = jnp.transpose(y, (0, 2, 4, 1, 3, 5))
    return y.reshape(B, nH * nW * C, k, k)


if __name__ == "__main__":
    key = jax.random.PRNGKey(0)
    B, C, H, W = 2, 4, 16, 16
    bs = 2  # block_size -> patch size k = H // bs = 8
    x = jax.random.normal(key, (B, C, H, W), dtype=jnp.float32)

    out = psi3_forward(x, bs)
    out = jax.block_until_ready(out)

    ref = psi3_reference(x, bs)
    assert out.shape == ref.shape, (out.shape, ref.shape)
    assert jnp.allclose(out, ref), "Pallas output mismatch vs reference"
    print("KERNEL_OK")
</pallas_src>

<mosaic_0001>
module attributes {stable_mosaic.version = 11 : i64} {
  func.func @_psi3_fast_kernel(%arg0: i32, %arg1: i32, %arg2: memref<1x4x16x16xf32, #tpu.memory_space<vmem>>, %arg3: memref<1x2x2x256xf32, #tpu.memory_space<vmem>>) attributes {dimension_semantics = [#tpu.dimension_semantics<parallel>, #tpu.dimension_semantics<parallel>], iteration_bounds = array<i64: 2, 1>, scalar_prefetch = 0 : i64, scratch_operands = 0 : i64, tpu.core_type = #tpu.core_type<tc>, window_params = [{transform_indices = @transform_0, window_bounds = array<i64: 1, 4, 16, 16>}, {transform_indices = @transform_1, window_bounds = array<i64: 1, 2, 2, 256>}]} {
    %c0 = arith.constant 0 : index
    %c0_0 = arith.constant 0 : index
    %c0_1 = arith.constant 0 : index
    %c0_2 = arith.constant 0 : index
    %0 = vector.load %arg2[%c0, %c0_0, %c0_1, %c0_2] : memref<1x4x16x16xf32, #tpu.memory_space<vmem>>, vector<1x4x16x16xf32>
    %1 = vector.shape_cast %0 : vector<1x4x16x16xf32> to vector<4x16x16xf32>
    %2 = vector.shape_cast %1 : vector<4x16x16xf32> to vector<4x2x8x2x8xf32>
    %3 = tpu.transpose %2, [1, 3, 0, 2, 4] : vector<4x2x8x2x8xf32> -> vector<2x2x4x8x8xf32>
    %4 = vector.shape_cast %3 : vector<2x2x4x8x8xf32> to vector<2x2x256xf32>
    %c0_3 = arith.constant 0 : index
    %c0_4 = arith.constant 0 : index
    %c0_5 = arith.constant 0 : index
    %c0_6 = arith.constant 0 : index
    %5 = vector.load %arg3[%c0_3, %c0_4, %c0_5, %c0_6] : memref<1x2x2x256xf32, #tpu.memory_space<vmem>>, vector<1x2x2x256xf32>
    %6 = vector.shape_cast %5 : vector<1x2x2x256xf32> to vector<2x2x256xf32>
    %7 = vector.shape_cast %4 : vector<2x2x256xf32> to vector<1x2x2x256xf32>
    tpu.vector_store %arg3[%c0_3, %c0_4, %c0_5, %c0_6], %7 {strides = array<i32>} : memref<1x2x2x256xf32, #tpu.memory_space<vmem>>, vector<1x2x2x256xf32>,
    return
  }
  func.func @transform_0(%arg0: i32, %arg1: i32) -> (i32, i32, i32, i32) {
    %c0_i32 = arith.constant 0 : i32
    %c0_i32_0 = arith.constant 0 : i32
    %c0_i32_1 = arith.constant 0 : i32
    return %arg0, %arg1, %c0_i32, %c0_i32_0 : i32, i32, i32, i32
  }
  func.func @transform_1(%arg0: i32, %arg1: i32) -> (i32, i32, i32, i32) {
    %c0_i32 = arith.constant 0 : i32
    %c0_i32_0 = arith.constant 0 : i32
    %c0_i32_1 = arith.constant 0 : i32
    return %arg0, %c0_i32, %c0_i32_0, %arg1 : i32, i32, i32, i32
  }
}

module attributes {stable_mosaic.version = 11 : i64} {
  func.func @_psi3_safe_kernel(%arg0: i32, %arg1: i32, %arg2: memref<1x4x8x16xf32, #tpu.memory_space<vmem>>, %arg3: memref<1x8x8x8xf32, #tpu.memory_space<vmem>>) attributes {dimension_semantics = [#tpu.dimension_semantics<parallel>, #tpu.dimension_semantics<parallel>], iteration_bounds = array<i64: 2, 2>, scalar_prefetch = 0 : i64, scratch_operands = 0 : i64, tpu.core_type = #tpu.core_type<tc>, window_params = [{transform_indices = @transform_0, window_bounds = array<i64: 1, 4, 8, 16>}, {transform_indices = @transform_1, window_bounds = array<i64: 1, 8, 8, 8>}]} {
    %c0 = arith.constant 0 : index
    %c0_0 = arith.constant 0 : index
    %c0_1 = arith.constant 0 : index
    %c0_2 = arith.constant 0 : index
    %0 = vector.load %arg2[%c0, %c0_0, %c0_1, %c0_2] : memref<1x4x8x16xf32, #tpu.memory_space<vmem>>, vector<1x4x8x16xf32>
    %1 = vector.shape_cast %0 : vector<1x4x8x16xf32> to vector<4x8x16xf32>
    %2 = vector.extract_strided_slice %1 {offsets = [0, 0, 0], sizes = [4, 8, 8], strides = [1, 1, 1]} : vector<4x8x16xf32> to vector<4x8x8xf32>
    %c0_3 = arith.constant 0 : index
    %c0_4 = arith.constant 0 : index
    %c0_5 = arith.constant 0 : index
    %c0_6 = arith.constant 0 : index
    %3 = vector.load %arg3[%c0_3, %c0_4, %c0_5, %c0_6] : memref<1x8x8x8xf32, #tpu.memory_space<vmem>>, vector<1x4x8x8xf32>
    %4 = vector.shape_cast %3 : vector<1x4x8x8xf32> to vector<4x8x8xf32>
    %5 = vector.shape_cast %2 : vector<4x8x8xf32> to vector<1x4x8x8xf32>
    tpu.vector_store %arg3[%c0_3, %c0_4, %c0_5, %c0_6], %5 {strides = array<i32>} : memref<1x8x8x8xf32, #tpu.memory_space<vmem>>, vector<1x4x8x8xf32>,
    %6 = vector.extract_strided_slice %1 {offsets = [0, 0, 8], sizes = [4, 8, 8], strides = [1, 1, 1]} : vector<4x8x16xf32> to vector<4x8x8xf32>
    %c0_7 = arith.constant 0 : index
    %c4 = arith.constant 4 : index
    %c0_8 = arith.constant 0 : index
    %c0_9 = arith.constant 0 : index
    %7 = vector.load %arg3[%c0_7, %c4, %c0_8, %c0_9] : memref<1x8x8x8xf32, #tpu.memory_space<vmem>>, vector<1x4x8x8xf32>
    %8 = vector.shape_cast %7 : vector<1x4x8x8xf32> to vector<4x8x8xf32>
    %9 = vector.shape_cast %6 : vector<4x8x8xf32> to vector<1x4x8x8xf32>
    tpu.vector_store %arg3[%c0_7, %c4, %c0_8, %c0_9], %9 {strides = array<i32>} : memref<1x8x8x8xf32, #tpu.memory_space<vmem>>, vector<1x4x8x8xf32>,
    return
  }
  func.func @transform_0(%arg0: i32, %arg1: i32) -> (i32, i32, i32, i32) {
    %c0_i32 = arith.constant 0 : i32
    %c0_i32_0 = arith.constant 0 : i32
    %c0_i32_1 = arith.constant 0 : i32
    return %arg0, %c0_i32, %arg1, %c0_i32_0 : i32, i32, i32, i32
  }
  func.func @transform_1(%arg0: i32, %arg1: i32) -> (i32, i32, i32, i32) {
    %c0_i32 = arith.constant 0 : i32
    %c0_i32_0 = arith.constant 0 : i32
    %c0_i32_1 = arith.constant 0 : i32
    return %arg0, %arg1, %c0_i32, %c0_i32_0 : i32, i32, i32, i32
  }
}

</mosaic_0001>

<bundles_post_ra>
// kernel: _psi3_safe.1
= control target key start
LH: loop header
LB: loop body
LE: loop exit
PB: predicated region body
PF: predicated region fallthrough
CT: control target
= control target key end

     0   :  { %6 = vsyncpa [#allocation3], 0  ;;  %s656_s0 = inlined_call_operand.hbm [shape: f32[2,4,16,16], index: 0, kind: input, shape index: {}]   ;;  %s657_s1 = inlined_call_operand.vmem [shape: f32[2,16,8,8], index: 1, kind: output, shape index: {}]  }
   0x1   :  { %8 = vsyncpa [#allocation3 + $0x1], 0  ;;  %s496_s6 = smov 0   ;;  %s498_s7 = smov 0  }
   0x2   :  { %s500_s8 = smov 0   ;;  %s502_s9 = smov 0  }
   0x3   :  { %s504_s10 = smov 0   ;;  %s506_s11 = smov 0  }
   0x4   :  { %s508_s12 = smov 0   ;;  %s510_s13 = smov 0  }
   0x5 LB: > { %s290_s14 = sadd.s32 4294967295, %s479_s13   ;;  %s23_s15 = sadd.s32 1, %s471_s11  ;;  %s479_s13 = sphi %s510_s13, %s14_s13   ;;  %s475_s12 = sphi %s508_s12, %s668_s12   ;;  %s471_s11 = sphi %s506_s11, %s667_s11   ;;  %s467_s10 = sphi %s504_s10, %s666_s10   ;;  %s463_s9 = sphi %s502_s9, %s665_s9   ;;  %s459_s8 = sphi %s500_s8, %s664_s8   ;;  %s455_s7 = sphi %s498_s7, %s663_s7   ;;  %s451_s6 = sphi %s496_s6, %s662_s6  }
   0x6   : > { %p24_p0 = scmp.ge.s32.totalorder %s23_s15, 2  ;;  %s26_s16 = sadd.s32 1, %s475_s12 }
   0x7   : > { %s35_s17 = sadd.s32 1, %s459_s8  ;;  %p42_p1 = scmp.ne.s32.totalorder %s459_s8, %s455_s7 }
   0x8   : > { %s670_s15 = smov (%p24_p0, %s23_s15), 0  ;;  %s672_s16 = smov (!%p24_p0, %s26_s16), %s475_s12 }
   0x9   : > { %s31_s18 = ssub.s32 %s471_s11, %s670_s15  ;;  %p43_p2 = scmp.eq.s32.totalorder %s479_s13, 0 }
   0xa   : > { %p28_p3 = scmp.ge.s32.totalorder %s672_s16, 2  ;;  %p48_p4 = scmp.ne.s32.totalorder %s455_s7, %s451_s6 }
   0xb   : > { %p547_p5 = por %p43_p2, %p42_p1  ;;  %p49_p6 = scmp.eq.s32.totalorder %s290_s14, 0 }
   0xc   : > { %s674_s16 = smov (%p28_p3, %s672_s16), 0  ;;  %p314_p8 = scmp.lt.s32.totalorder %s479_s13, 4 }
   0xd   : > { %p553_p7 = por %p49_p6, %p48_p4  ;;  %s30_s21 = ssub.s32 %s475_s12, %s674_s16 }
   0xe   : > { %s32_s22 = sor.u32 %s31_s18, %s30_s21  ;;  %s100_s23 = sand.u32 1, %s459_s8  }
   0xf   : > { %p33_p9 = scmp.eq.s32.totalorder %s32_s22, 0  ;;  %s294_s24 = sshll.u32 %s100_s23, 5 }
  0x10   : > { %s295_s25 = sshll.u32 %s475_s12, 3  ;;  %s104_s29 = scalar_lea.vmem [#allocation2], %s294_s24 }
  0x11   : > { %s563_s26 = scalar_select %p33_p9, %s459_s8, %s35_s17  }
  0x12   : > { %s109_s27 = sadd.s32 %s471_s11, %s295_s25  ;;  %s112_s30 = sshll.u32 %s104_s29, 4  ;;  %s571_s30 = int_to_ptr.vmem [resolvable:$true] %s112_s30 }
  0x13   : > { %s296_s28 = sshll.u32 %s109_s27, 7  ;;  %p577_p10 = pnand %p314_p8, %p547_p5 }
  0x14   : > { %s569_s4 = scalar_lea.hbm %s656_s0, %s296_s28  ;;  %s582_s6 = scalar_lea.sflag [#allocation3], %s100_s23 }
  0x15   : > { %s383_s14 = scalar_lea.hbm %s569_s4, 512  ;;  %p385_p13 = pneg %p577_p10 }
  0x16   : > { %p384_p12 = scmp.ne.s32.totalorder %s569_s4, %s383_s14  ;;  %s388_s19 = scalar_lea.hbm %s656_s0, 2048 }
  0x17   : > { %p389_p2 = scmp.lt.u32.totalorder %s569_s4, %s656_s0  ;;  %p390_p3 = scmp.lt.u32.totalorder %s388_s19, %s383_s14 }
  0x18   : > { %p386_p0 = pnand %p385_p13, %p384_p12  ;;  %p392_p5 = scmp.lt.u32.totalorder %s383_s14, %s569_s4 }
  0x19   : > { %p391_p4 = por %p390_p3, %p389_p2 }
  0x1a   : > { %p387_p1 = pneg %p386_p0 }
  0x1b   : > { %p393_p6 = por %p392_p5, %p391_p4 }
  0x1d   : > { %p394_p8 = pnand %p393_p6, %p387_p1 }
  0x1f   : > { %397 = shalt.err (!%p394_p8)
}
  0x20   : > { %s398_s23 = scalar_lea.vmem %s571_s30, 512  ;;  %s481_s24 = smov [#allocation2]  }
  0x21   : > { %p399_p9 = scmp.ne.s32.totalorder %s571_s30, %s398_s23  ;;  %s403_s25 = sshll.u32 %s481_s24, 4  ;;  %s404_s25 = int_to_ptr.vmem [resolvable:$false] %s403_s25 }
  0x22   : > { %s405_s27 = scalar_lea.vmem %s404_s25, 1024  ;;  %p406_p11 = scmp.lt.s32.totalorder %s571_s30, %s404_s25 }
  0x23   : > { %p401_p12 = pnand %p399_p9, %p385_p13  ;;  %p407_p2 = scmp.lt.s32.totalorder %s405_s27, %s398_s23 }
  0x25   : > { %p402_p0 = pneg %p401_p12  ;;  %p408_p3 = por %p407_p2, %p406_p11 }
  0x27   : > { %p409_p4 = pnand %p408_p3, %p402_p0 }
  0x29   : > { %412 = shalt.err (!%p409_p4)
}
  0x2a   : > { %s482_s28 = smov 256   ;;  %s483_s29 = smov 128  }
  0x2b   : > { %s484_s2 = smov 8   ;;  %p120_p13 = scmp.lt.s32.totalorder %s479_s13, 5 }
  0x2c   : > { %313 = dma.hbm_to_vmem [thread:$0]  (!%p577_p10), %s569_s4, 512, %s571_s30, %s582_s6, %s482_s28, %s483_s29, %s484_s2  }
  0x2d   : > { %p661_p1 = scmp.ge.s32.totalorder %s479_s13, 1 }
  0x2f   : > { %p121_p5 = pnand %p661_p1, %p120_p13 }
  0x30   : > { %s126_s3 = sand.u32 (!%p121_p5), 1, %s455_s7  }
  0x31   : > { %124 = sbr.rel (%p121_p5) target bundleno = 179 (0xb3), region = 24  ;;  %s298_s14 = sshll.u32 (!%p121_p5), %s126_s3, 5 }
  0x32   : > { %s127_s17 = scalar_lea.sflag (!%p121_p5), [#allocation3], %s126_s3  ;;  %s130_s18 = scalar_lea.vmem (!%p121_p5), [#allocation2], %s298_s14 }
  0x38   : > { %446 = dma.done.wait (%p553_p7), %s127_s17, 512  }
  0x39   : > { %448 = vsyncadd (%p553_p7), %s127_s17, 4294966784  ;;  %s299_s5 = sshll.u32 %s463_s9, 3  ;;  %p154_p10 = scmp.lt.s32.totalorder %s467_s10, 1  ;;  %v165_v0 = vld [vmem:[%s130_s18 + $0x10] sm:$0xff]  ;;  %vm167_vm0 = vcmask 64512   ;;  %v163_v1 = vld [vmem:[%s130_s18] sm:$0xff] }
  0x3a   : > { %p156_p11 = scmp.lt.s32.totalorder %s299_s5, 15  ;;  %v166_v2 = vld [vmem:[%s130_s18 + $0x18] sm:$0xff]  ;;  %s485_s20 = smov 120   ;;  %v164_v3 = vld [vmem:[%s130_s18 + $0x8] sm:$0xff] }
  0x3b   : > { %s676_s10 = smov (!%p154_p10, %s467_s10), 1  ;;  %180 = vrot.lane.b32.xlu1 %v165_v0, %s485_s20  ;;  %176 = vrot.lane.b32.xlu0 %v163_v1, %s485_s20 }
  0x3c   : > { %s678_s5 = smov (!%p156_p11, %s299_s5), 15  ;;  %s300_s30 = sshll.u32 %s676_s10, 4 }
  0x3d   : > { %s159_s4 = sadd.s32 %s300_s30, %s678_s5 }
  0x3e   : > { %s301_s6 = sshll.u32 %s159_s4, 3 }
  0x3f   : > { %s161_s22 = scalar_lea.vmem %s657_s1, %s301_s6  ;;  %182 = vrot.lane.b32.xlu1 %v166_v2, %s485_s20  ;;  %178 = vrot.lane.b32.xlu0 %v164_v3, %s485_s20 }
  0x40   : > { %170 = vst.msk [vmem:[%s161_s22 + $0x10] sm:$0xff] %vm167_vm0, %v165_v0  ;;  %168 = vst.msk [vmem:[%s161_s22] sm:$0xff] %vm167_vm0, %v163_v1 }
  0x41   : > { %171 = vst.msk [vmem:[%s161_s22 + $0x18] sm:$0xff] %vm167_vm0, %v166_v2  ;;  %169 = vst.msk [vmem:[%s161_s22 + $0x8] sm:$0xff] %vm167_vm0, %v164_v3 }
  0xad   : > { %v181_v4 = vpop.permute.xlu1 %180  ;;  %v177_v5 = vpop.permute.xlu0 %176 }
  0xae   : > { %304 = vst.msk [vmem:[%s161_s22 + $0x30] sm:$0xff] %vm167_vm0, %v181_v4  ;;  %302 = vst.msk [vmem:[%s161_s22 + $0x20] sm:$0xff] %vm167_vm0, %v177_v5 }
  0xb1   : > { %v183_v6 = vpop.permute.xlu1 %182  ;;  %v179_v7 = vpop.permute.xlu0 %178 }
  0xb2   : > { %305 = vst.msk [vmem:[%s161_s22 + $0x38] sm:$0xff] %vm167_vm0, %v183_v6  ;;  %303 = vst.msk [vmem:[%s161_s22 + $0x28] sm:$0xff] %vm167_vm0, %v179_v7 }
  0xb3 PF: > { %s14_s13 = sadd.s32 1, %s479_s13   ;;  %s662_s6 = smov %s455_s7 }
  0xb4   : > { %p11_p7 = scmp.ge.s32.totalorder %s14_s13, 6   ;;  %s663_s7 = smov %s459_s8 }
  0xb5   : > { %s664_s8 = smov %s563_s26  ;;  %s665_s9 = smov %s471_s11 }
  0xb6   : > { %s666_s10 = smov %s475_s12  ;;  %s667_s11 = smov %s670_s15 }
  0xb7   : > { %s668_s12 = smov %s674_s16  ;;  %13 = sbr.rel (!%p11_p7) target bundleno = 5 (0x5), region = 65 }
  0xbe   :  { %223 = vsyncpa [#allocation3], 1 }
  0xbf   :  { %225 = vsyncpa [#allocation3 + $0x1], 1 }

</bundles_post_ra>
